<compile_context>
chip_gen: v7x
topology: tpu7x:2x2x1
jax: 0.10.0
libtpu: 0.0.40
codegen_flags: <defaults>
</compile_context>

<pallas_src>
import math

import jax
import jax.numpy as jnp
from jax.experimental import pallas as pl
from jax.experimental.pallas import tpu as pltpu

KH = KW = 8
STRIDE = 4
OC = 16  # conv1 out_channels


def _round_up(x, m):
    return (x + m - 1) // m * m


def reward_kernel(x_ref, w_ref, b_ref, o_ref, acc_ref):
    """grid = (batch_tiles, k_tiles); the reduction axis k is innermost."""
    k = pl.program_id(1)

    @pl.when(k == 0)
    def _init():
        acc_ref[...] = jnp.zeros_like(acc_ref)

    # Streaming mat-vec on the MXU: bf16 (or f32) inputs, f32 accumulation.
    acc_ref[...] += jnp.dot(x_ref[...], w_ref[...],
                            preferred_element_type=jnp.float32)

    @pl.when(k == pl.num_programs(1) - 1)
    def _finalize():
        o_ref[...] = acc_ref[...] + b_ref[0]   # folded bias (conv_b ⊕ fc_b) from SMEM


def reward_forward(state, action, conv_w, conv_b, fc_w, fc_b,
                   *, compute_dtype=jnp.bfloat16, block_b=None, block_k=None):
    """state: (N, C, H, W) NCHW float32; action: (N,) int.  Returns (N, 1) float32."""
    N, C, H, W = state.shape
    H1 = H + 1
    OH = (H1 - KH) // STRIDE + 1
    OW = (W - KW) // STRIDE + 1
    D = C * H1 * W
    f32 = jnp.float32

    # ---- host-side weight folding (O(params), data independent) -------------------
    # fc1 weight in torch flatten order (oc, oh, ow):
    g = fc_w.reshape(OC, OH, OW).astype(f32)
    # fold fc1 into conv1: w_eff[oh, ow, c, kh, kw] = sum_oc g[oc,oh,ow] * conv_w[oc,c,kh,kw]
    w_eff = jnp.einsum("oab,ockl->abckl", g, conv_w.astype(f32))         # (OH, OW, C, KH, KW)
    # fold the overlapping stride-4 windows into a single per-pixel weight image.
    w_img = jnp.zeros((C, H1, W), f32)
    for kh in range(KH):
        for kw in range(KW):
            w_img = w_img.at[:, kh:kh + STRIDE * OH:STRIDE,
                                kw:kw + STRIDE * OW:STRIDE].add(
                jnp.transpose(w_eff[:, :, :, kh, kw], (2, 0, 1)))        # (C, OH, OW)
    b_eff = (fc_b.astype(f32).reshape(()) +
             jnp.sum(conv_b.astype(f32) * jnp.sum(g, axis=(1, 2)))).reshape(1)

    # ---- per-sample input: one-hot action row appended along H (torch cat dim=2) --
    onehot = jax.nn.one_hot(action.astype(jnp.int32), W, dtype=state.dtype)
    sa = jnp.concatenate([state, onehot[:, None, None, :]], axis=2)      # (N, C, H+1, W)
    x = sa.reshape(N, D)

    # ---- tiling / padding ----------------------------------------------------------
    LANE = 128
    if block_k is None:
        d128 = _round_up(D, LANE)
        TK = d128 if d128 <= 2048 else 2048
    else:
        TK = block_k
    D_pad = _round_up(D, TK)
    if block_b is None:
        TB = 256 if N >= 256 else _round_up(N, 8)
    else:
        TB = block_b
    N_pad = _round_up(N, TB)

    x_p = jnp.pad(x.astype(compute_dtype), ((0, N_pad - N), (0, D_pad - D)))
    w_p = jnp.pad(w_img.reshape(D, 1).astype(compute_dtype), ((0, D_pad - D), (0, 0)))

    grid = (N_pad // TB, D_pad // TK)
    itemsize = jnp.dtype(compute_dtype).itemsize
    cost = pl.CostEstimate(
        flops=2 * N_pad * D_pad,
        transcendentals=0,
        bytes_accessed=(N_pad * D_pad + D_pad) * itemsize + N_pad * 4)

    out = pl.pallas_call(
        reward_kernel,
        out_shape=jax.ShapeDtypeStruct((N_pad, 1), jnp.float32),
        grid=grid,
        in_specs=[
            pl.BlockSpec((TB, TK), lambda i, k: (i, k)),            # streamed input tiles
            pl.BlockSpec((TK, 1), lambda i, k: (k, 0)),             # folded weight column
            pl.BlockSpec(memory_space=pltpu.MemorySpace.SMEM),      # folded scalar bias
        ],
        out_specs=pl.BlockSpec((TB, 1), lambda i, k: (i, 0)),
        scratch_shapes=[pltpu.VMEM((TB, 1), jnp.float32)],
        compiler_params=pltpu.CompilerParams(
            dimension_semantics=("parallel", "arbitrary"),
            vmem_limit_bytes=32 * 1024 * 1024),
        cost_estimate=cost,
    )(x_p, w_p, b_eff)

    return out[:N]


def reference_forward(state, action, conv_w, conv_b, fc_w, fc_b):
    """Pure-JAX reference mirroring the PyTorch forward exactly."""
    N, C, H, W = state.shape
    onehot = jax.nn.one_hot(action.astype(jnp.int32), W, dtype=state.dtype)
    sa = jnp.concatenate([state, onehot[:, None, None, :]], axis=2)
    conv = jax.lax.conv_general_dilated(
        sa, conv_w, window_strides=(STRIDE, STRIDE), padding="VALID",
        dimension_numbers=("NCHW", "OIHW", "NCHW"))
    conv = conv + conv_b[None, :, None, None]
    flat = conv.reshape(N, -1)
    return flat @ fc_w.T + fc_b[None, :]


if __name__ == "__main__":
    # state_dimension = (C, H, W); C must be 1 for torch.cat(dim=2) to be shape-valid.
    C, H, W = 1, 15, 16
    N = 2

    OH = (H + 1 - KH) // STRIDE + 1
    OW = (W - KW) // STRIDE + 1
    P = OH * OW

    key = jax.random.PRNGKey(0)
    k_state, k_act, k_cw, k_fw = jax.random.split(key, 4)

    state = jax.random.normal(k_state, (N, C, H, W), dtype=jnp.float32)
    action = jax.random.randint(k_act, (N,), 0, W)

    # Deterministic synthetic parameters (module init shapes; biases zero as in __init__).
    conv_w = jax.random.normal(k_cw, (OC, C, KH, KW), dtype=jnp.float32) * math.sqrt(2.0 / (C * KH * KW))
    conv_b = jnp.zeros((OC,), dtype=jnp.float32)
    fc_w = jax.random.normal(k_fw, (1, OC * P), dtype=jnp.float32) * (1.0 / math.sqrt(OC * P))
    fc_b = jnp.zeros((1,), dtype=jnp.float32)

    ref = reference_forward(state, action, conv_w, conv_b, fc_w, fc_b)

    # 1) f32 streaming path (tight tolerance).
    out_f32 = jax.block_until_ready(
        reward_forward(state, action, conv_w, conv_b, fc_w, fc_b, compute_dtype=jnp.float32))
    assert out_f32.shape == (N, 1), out_f32.shape
    assert jnp.allclose(out_f32, ref, atol=2e-4, rtol=2e-4), (out_f32, ref)

    # 2) bf16-streamed path (default) with f32 accumulation: looser tolerance.
    out_bf16 = jax.block_until_ready(
        reward_forward(state, action, conv_w, conv_b, fc_w, fc_b))
    assert out_bf16.shape == (N, 1), out_bf16.shape
    assert jnp.allclose(out_bf16, ref, atol=5e-2, rtol=5e-2), (out_bf16, ref)

    # 3) Larger batch / odd spatial size with non-zero biases: exercises the multi-step
    #    (batch, reduction) grid, the f32 accumulator, and zero-padding on both axes.
    C2, H2, W2 = 1, 23, 20
    N2 = 24
    OH2 = (H2 + 1 - KH) // STRIDE + 1
    OW2 = (W2 - KW) // STRIDE + 1
    P2 = OH2 * OW2
    k_s2, k_a2, k_cw2, k_fw2 = jax.random.split(jax.random.PRNGKey(1), 4)
    state2 = jax.random.normal(k_s2, (N2, C2, H2, W2), dtype=jnp.float32)
    action2 = jax.random.randint(k_a2, (N2,), 0, W2)
    conv_w2 = jax.random.normal(k_cw2, (OC, C2, KH, KW), dtype=jnp.float32) * math.sqrt(2.0 / (C2 * KH * KW))
    conv_b2 = jax.random.normal(jax.random.PRNGKey(2), (OC,), dtype=jnp.float32) * 0.1
    fc_w2 = jax.random.normal(k_fw2, (1, OC * P2), dtype=jnp.float32) * (1.0 / math.sqrt(OC * P2))
    fc_b2 = jnp.ones((1,), dtype=jnp.float32) * 0.3

    ref2 = reference_forward(state2, action2, conv_w2, conv_b2, fc_w2, fc_b2)
    out2 = jax.block_until_ready(
        reward_forward(state2, action2, conv_w2, conv_b2, fc_w2, fc_b2,
                       compute_dtype=jnp.float32, block_b=8, block_k=128))
    assert out2.shape == (N2, 1), out2.shape
    assert jnp.allclose(out2, ref2, atol=2e-4, rtol=2e-4), (out2, ref2)

    print("KERNEL_OK")
</pallas_src>

<mosaic_0001>
module attributes {stable_mosaic.version = 11 : i64} {
  func.func @reward_kernel(%arg0: i32, %arg1: i32, %arg2: memref<8x256xf32, #tpu.memory_space<vmem>>, %arg3: memref<256x1xf32, #tpu.memory_space<vmem>>, %arg4: memref<1xf32, #tpu.memory_space<smem>>, %arg5: memref<8x1xf32, #tpu.memory_space<vmem>>, %arg6: memref<8x1xf32, #tpu.memory_space<vmem>>) attributes {dimension_semantics = [#tpu.dimension_semantics<parallel>, #tpu.dimension_semantics<arbitrary>], iteration_bounds = array<i64: 1, 1>, scalar_prefetch = 0 : i64, scratch_operands = 1 : i64, tpu.core_type = #tpu.core_type<tc>, window_params = [{transform_indices = @transform_0, window_bounds = array<i64: 8, 256>}, {transform_indices = @transform_1, window_bounds = array<i64: 256, 1>}, {transform_indices = @transform_2, window_bounds = array<i64: 1>}, {transform_indices = @transform_3, window_bounds = array<i64: 8, 1>}]} {
    %c0_i32 = arith.constant 0 : i32
    %0 = arith.cmpi eq, %arg1, %c0_i32 : i32
    %1 = arith.extui %0 : i1 to i32
    %c0_i32_0 = arith.constant 0 : i32
    %2 = arith.cmpi ne, %1, %c0_i32_0 : i32
    scf.if %2 {
      %cst_10 = arith.constant 0.000000e+00 : f32
      %12 = vector.broadcast %cst_10 : f32 to vector<8x1xf32>
      %c0_11 = arith.constant 0 : index
      %c0_12 = arith.constant 0 : index
      %13 = vector.load %arg6[%c0_11, %c0_12] : memref<8x1xf32, #tpu.memory_space<vmem>>, vector<8x1xf32>
      tpu.vector_store %arg6[%c0_11, %c0_12], %12 {strides = array<i32>} : memref<8x1xf32, #tpu.memory_space<vmem>>, vector<8x1xf32>,
    } else {
    }
    %c0 = arith.constant 0 : index
    %c0_1 = arith.constant 0 : index
    %3 = vector.load %arg6[%c0, %c0_1] : memref<8x1xf32, #tpu.memory_space<vmem>>, vector<8x1xf32>
    %c0_2 = arith.constant 0 : index
    %c0_3 = arith.constant 0 : index
    %4 = vector.load %arg2[%c0_2, %c0_3] : memref<8x256xf32, #tpu.memory_space<vmem>>, vector<8x256xf32>
    %c0_4 = arith.constant 0 : index
    %c0_5 = arith.constant 0 : index
    %5 = vector.load %arg3[%c0_4, %c0_5] : memref<256x1xf32, #tpu.memory_space<vmem>>, vector<256x1xf32>
    %cst = arith.constant dense<0.000000e+00> : vector<8x1xf32>
    %6 = tpu.matmul %4, %5, %cst {dimension_numbers = #tpu.dot_dimension_numbers<[1], [0], [0], [1], [0, 0, 1, 1], [], []>} : vector<8x256xf32>, vector<256x1xf32>, vector<8x1xf32> -> vector<8x1xf32>
    %7 = arith.addf %3, %6 : vector<8x1xf32>
    %c0_6 = arith.constant 0 : index
    %c0_7 = arith.constant 0 : index
    %8 = vector.load %arg6[%c0_6, %c0_7] : memref<8x1xf32, #tpu.memory_space<vmem>>, vector<8x1xf32>
    tpu.vector_store %arg6[%c0_6, %c0_7], %7 {strides = array<i32>} : memref<8x1xf32, #tpu.memory_space<vmem>>, vector<8x1xf32>,
    %c0_i32_8 = arith.constant 0 : i32
    %9 = arith.cmpi eq, %arg1, %c0_i32_8 : i32
    %10 = arith.extui %9 : i1 to i32
    %c0_i32_9 = arith.constant 0 : i32
    %11 = arith.cmpi ne, %10, %c0_i32_9 : i32
    scf.if %11 {
      %c0_10 = arith.constant 0 : index
      %c0_11 = arith.constant 0 : index
      %12 = vector.load %arg6[%c0_10, %c0_11] : memref<8x1xf32, #tpu.memory_space<vmem>>, vector<8x1xf32>
      %c0_12 = arith.constant 0 : index
      %13 = memref.load %arg4[%c0_12] : memref<1xf32, #tpu.memory_space<smem>>
      %14 = vector.broadcast %13 : f32 to vector<8x1xf32>
      %15 = arith.addf %12, %14 : vector<8x1xf32>
      %c0_13 = arith.constant 0 : index
      %c0_14 = arith.constant 0 : index
      %16 = vector.load %arg5[%c0_13, %c0_14] : memref<8x1xf32, #tpu.memory_space<vmem>>, vector<8x1xf32>
      tpu.vector_store %arg5[%c0_13, %c0_14], %15 {strides = array<i32>} : memref<8x1xf32, #tpu.memory_space<vmem>>, vector<8x1xf32>,
    } else {
    }
    return
  }
  func.func @transform_0(%arg0: i32, %arg1: i32) -> (i32, i32) {
    %c0_i32 = arith.constant 0 : i32
    return %arg0, %arg1 : i32, i32
  }
  func.func @transform_1(%arg0: i32, %arg1: i32) -> (i32, i32) {
    %c0_i32 = arith.constant 0 : i32
    %c0_i32_0 = arith.constant 0 : i32
    return %arg1, %c0_i32 : i32, i32
  }
  func.func @transform_2(%arg0: i32, %arg1: i32) -> i32 {
    %c0_i32 = arith.constant 0 : i32
    %c0_i32_0 = arith.constant 0 : i32
    return %c0_i32 : i32
  }
  func.func @transform_3(%arg0: i32, %arg1: i32) -> (i32, i32) {
    %c0_i32 = arith.constant 0 : i32
    %c0_i32_0 = arith.constant 0 : i32
    return %arg0, %c0_i32 : i32, i32
  }
}

</mosaic_0001>

<bundles_post_ra>
// kernel: tpu_custom_call.1
= control target key start
LH: loop header
LB: loop body
LE: loop exit
PB: predicated region body
PF: predicated region fallthrough
CT: control target
= control target key end

     0   :  { %vm19_vm0 = vcmask 7168   ;;  %v209_v50 = vmov 0.0   ;;  %s338_s1 = inlined_call_operand.vmem [shape: f32[256,1], index: 1, kind: input, shape index: {}]   ;;  %s339_s0 = inlined_call_operand.vmem [shape: f32[8,256], index: 0, kind: input, shape index: {}]   ;;  %s340_s2 = inlined_call_operand.<no memory space> [shape: f32[1], index: 2, kind: input, shape index: {}]   ;;  %s341_s3 = inlined_call_operand.vmem [shape: f32[8,1], index: 3, kind: output, shape index: {}]  }
   0x1   :  { %v40_v0 = vld [vmem:[%s338_s1 + $0x80] sm:$0xff]  ;;  %v41_v1 = vld [vmem:[%s338_s1 + $0x88] sm:$0xff]  ;;  %v42_v5 = vld [vmem:[%s338_s1 + $0x90] sm:$0xff]  ;;  %20 = vst.msk [vmem:[#allocation2] sm:$0xff] %vm19_vm0, %v209_v50  ;;  %v134_v56 = vstv %s340_s2 }
   0x2   :  { %v24_v2 = vld [vmem:[%s338_s1] sm:$0xff]  ;;  %v176_v3 = vpack.c.bf16 %v41_v1, %v40_v0  ;;  %v25_v4 = vld [vmem:[%s338_s1 + $0x8] sm:$0xff]  ;;  %v43_v6 = vld [vmem:[%s338_s1 + $0x98] sm:$0xff] }
   0x3   :  { %v178_v7 = vpack.c.bf16 %v25_v4, %v24_v2  ;;  %v180_v8 = vpack.c.bf16 %v43_v6, %v42_v5  ;;  %v26_v9 = vld [vmem:[%s338_s1 + $0x10] sm:$0xff]  ;;  %v27_v10 = vld [vmem:[%s338_s1 + $0x18] sm:$0xff]  ;;  %v44_v11 = vld [vmem:[%s338_s1 + $0xa0] sm:$0xff] }
   0x4   :  { %177 = vmatprep.subr.bf16.mxu0 %v176_v3  ;;  %v45_v12 = vld [vmem:[%s338_s1 + $0xa8] sm:$0xff]  ;;  %v182_v13 = vpack.c.bf16 %v27_v10, %v26_v9  ;;  %v28_v15 = vld [vmem:[%s338_s1 + $0x20] sm:$0xff]  ;;  %v46_v17 = vld [vmem:[%s338_s1 + $0xb0] sm:$0xff] }
   0x5   :  { %179 = vmatpush3.bf16.msra.mxu0 %v178_v7  ;;  %v184_v14 = vpack.c.bf16 %v45_v12, %v44_v11  ;;  %v29_v16 = vld [vmem:[%s338_s1 + $0x28] sm:$0xff]  ;;  %v47_v18 = vld [vmem:[%s338_s1 + $0xb8] sm:$0xff]  ;;  %v30_v21 = vld [vmem:[%s338_s1 + $0x30] sm:$0xff] }
   0x6   :  { %181 = vmatprep.subr.bf16.mxu0 %v180_v8  ;;  %v186_v19 = vpack.c.bf16 %v29_v16, %v28_v15  ;;  %v188_v20 = vpack.c.bf16 %v47_v18, %v46_v17  ;;  %v31_v22 = vld [vmem:[%s338_s1 + $0x38] sm:$0xff]  ;;  %v48_v23 = vld [vmem:[%s338_s1 + $0xc0] sm:$0xff]  ;;  %v49_v24 = vld [vmem:[%s338_s1 + $0xc8] sm:$0xff] }
   0x7   :  { %v23_v25 = vld [vmem:[%s339_s0 + $0x8] sm:$0xff]  ;;  %v190_v26 = vpack.c.bf16 %v31_v22, %v30_v21  ;;  %v192_v27 = vpack.c.bf16 %v49_v24, %v48_v23  ;;  %v32_v28 = vld [vmem:[%s338_s1 + $0x40] sm:$0xff]  ;;  %v50_v30 = vld [vmem:[%s338_s1 + $0xd0] sm:$0xff] }
   0x8   :  { %120 = vmatprep.mubr.f32.mxu0 %v23_v25  ;;  %v33_v29 = vld [vmem:[%s338_s1 + $0x48] sm:$0xff]  ;;  %v51_v31 = vld [vmem:[%s338_s1 + $0xd8] sm:$0xff]  ;;  %v34_v34 = vld [vmem:[%s338_s1 + $0x50] sm:$0xff] }
   0x9   :  { %183 = vmatpush3.bf16.msra.mxu0 %v182_v13  ;;  %v194_v32 = vpack.c.bf16 %v33_v29, %v32_v28  ;;  %v196_v33 = vpack.c.bf16 %v51_v31, %v50_v30  ;;  %v35_v35 = vld [vmem:[%s338_s1 + $0x58] sm:$0xff]  ;;  %v52_v36 = vld [vmem:[%s338_s1 + $0xe0] sm:$0xff]  ;;  %v53_v37 = vld [vmem:[%s338_s1 + $0xe8] sm:$0xff] }
   0xa   :  { %185 = vmatprep.subr.bf16.mxu0 %v184_v14  ;;  %v198_v38 = vpack.c.bf16 %v35_v35, %v34_v34  ;;  %v200_v39 = vpack.c.bf16 %v53_v37, %v52_v36  ;;  %v36_v40 = vld [vmem:[%s338_s1 + $0x60] sm:$0xff]  ;;  %v37_v41 = vld [vmem:[%s338_s1 + $0x68] sm:$0xff]  ;;  %v54_v42 = vld [vmem:[%s338_s1 + $0xf0] sm:$0xff] }
   0xb   :  { %v55_v43 = vld [vmem:[%s338_s1 + $0xf8] sm:$0xff]  ;;  %v202_v44 = vpack.c.bf16 %v37_v41, %v36_v40  ;;  %v38_v46 = vld [vmem:[%s338_s1 + $0x70] sm:$0xff]  ;;  %v22_v49 = vld [vmem:[%s339_s0] sm:$0xff] }
   0xc   :  { %v204_v45 = vpack.c.bf16 %v55_v43, %v54_v42  ;;  %v39_v47 = vld [vmem:[%s338_s1 + $0x78] sm:$0xff]  ;;  %v21_v52 = vld [vmem:[#allocation2] sm:$0xff] }
   0xd   :  { %187 = vmatpush3.bf16.msra.mxu0 %v186_v19  ;;  %v206_v48 = vpack.c.bf16 %v39_v47, %v38_v46 }
   0xe   :  { %189 = vmatprep.subr.bf16.mxu0 %v188_v20 }
  0x11   :  { %191 = vmatpush3.bf16.msra.mxu0 %v190_v26 }
  0x12   :  { %193 = vmatprep.subr.bf16.mxu0 %v192_v27 }
  0x15   :  { %195 = vmatpush3.bf16.msra.mxu0 %v194_v32 }
  0x16   :  { %197 = vmatprep.subr.bf16.mxu0 %v196_v33 }
  0x19   :  { %199 = vmatpush3.bf16.msra.mxu0 %v198_v38 }
  0x1a   :  { %201 = vmatprep.subr.bf16.mxu0 %v200_v39 }
  0x1d   :  { %203 = vmatpush3.bf16.msra.mxu0 %v202_v44 }
  0x1e   :  { %205 = vmatprep.subr.bf16.mxu0 %v204_v45 }
  0x21   :  { %207 = vmatpush3.bf16.msra.mxu0 %v206_v48 }
  0x24   :  { %121 = vmatmul.mubr.f32.vlgmr.msra.gmra.mrb[0].mxu0 %v22_v49 }
  0xf7   :  { %v173_v51 = vpop.f32.mrb[0].mxu0 }
  0xf8   :  { %v174_v53 = vpop.f32.mrb[1].mxu0 }
  0xf9   :  { %v175_v54 = vadd.f32 %v174_v53, %v173_v51 }
  0xfb   :  { %v126_v55 = vadd.f32 %v175_v54, %v21_v52 }
  0xfd   :  { %128 = vst.msk [vmem:[#allocation2] sm:$0xff] %vm19_vm0, %v126_v55 }
 0x104   :  { %v132_v57 = vld [vmem:[#allocation2] sm:$0xff] }
 0x105   :  { %v135_v58 = vadd.f32 %v134_v56, %v132_v57 }
 0x107   :  { %136 = vst.msk [vmem:[%s341_s3] sm:$0xff] %vm19_vm0, %v135_v58 }

</bundles_post_ra>
